<compile_context>
chip_gen: v5e
topology: v5e:2x2
jax: 0.10.0
libtpu: 0.0.40
codegen_flags: <defaults>
</compile_context>

<pallas_src>
import functools

import numpy as np
import jax
import jax.numpy as jnp
from jax.experimental import pallas as pl
from jax.experimental.pallas import tpu as pltpu


def _round_up(x, m):
    return ((x + m - 1) // m) * m


# ----------------------------- Pallas kernel -------------------------------
def film_kernel(x_ref, w_ref, gain_ref, beta_ref, o_ref, *,
                mxu_dtype, epilogue_dtype):
    """One (seq-tile n, batch b) grid step.

    x_ref    : (TN, Cin)   f32 (cast to mxu_dtype in-VMEM if requested)
    w_ref    : (Cin, Cout) mxu_dtype  (resident every step)
    gain_ref : (1, Cout)   f32        (style@Wg + bg) * 15 + 30
    beta_ref : (1, Cout)   f32        gain * b_lin + (style@Wb + bb)
    o_ref    : (TN, Cout)  out_dtype
    """
    x = x_ref[...].astype(mxu_dtype)          # no-op when mxu_dtype == f32
    h = jnp.dot(x, w_ref[...], preferred_element_type=jnp.float32)

    # Epilogue in epilogue_dtype (f32 default; bf16 halves VPU vreg traffic on
    # v6e/v7x where the sin polynomial, not HBM, is the binding slot).
    h = h.astype(epilogue_dtype)
    g = gain_ref[...].astype(epilogue_dtype)
    b = beta_ref[...].astype(epilogue_dtype)
    o_ref[...] = jnp.sin(g * h + b).astype(o_ref.dtype)


# ------------------------------ wrapper ------------------------------------
def film_layer(x, style, params, *, tile_n=1024,
               mxu_dtype=jnp.float32,
               epilogue_dtype=jnp.float32,
               out_dtype=jnp.float32):
    """x: (B, N, Cin) f32, style: (B, S) f32 -> (B, N, Cout) out_dtype."""
    B, N, Cin = x.shape
    Cout = params["w_lin"].shape[1]

    # ---- style path hoisted out of the kernel (tiny (B,S)x(S,Cout) dots) ----
    gain = (style @ params["w_gain"] + params["b_gain"]) * 15.0 + 30.0   # (B, Cout)
    bias = style @ params["w_bias"] + params["b_bias"]                   # (B, Cout)
    beta = gain * params["b_lin"] + bias                                 # fold b_lin

    w = params["w_lin"].astype(mxu_dtype)               # tiny, VMEM-resident
    gain3 = gain.reshape(B, 1, Cout).astype(jnp.float32)
    beta3 = beta.reshape(B, 1, Cout).astype(jnp.float32)

    # Big sequence tile; cdiv grid + Pallas edge masking -> no x pad / out slice.
    TN = min(tile_n, _round_up(N, 8))                   # sublane-aligned
    n_tiles = pl.cdiv(N, TN)

    out_itemsize = jnp.dtype(out_dtype).itemsize
    cost = pl.CostEstimate(
        flops=2 * B * N * Cin * Cout,
        transcendentals=B * N * Cout,
        bytes_accessed=(x.size * x.dtype.itemsize
                        + w.size * w.dtype.itemsize
                        + gain3.size * 4 + beta3.size * 4
                        + B * N * Cout * out_itemsize))

    kernel = functools.partial(film_kernel,
                               mxu_dtype=mxu_dtype,
                               epilogue_dtype=epilogue_dtype)

    out = pl.pallas_call(
        kernel,
        out_shape=jax.ShapeDtypeStruct((B, N, Cout), out_dtype),
        grid=(n_tiles, B),
        in_specs=[
            pl.BlockSpec((None, TN, Cin),  lambda n, b: (b, n, 0)),  # x tile
            pl.BlockSpec((Cin, Cout),      lambda n, b: (0, 0)),     # W_lin (resident)
            pl.BlockSpec((None, 1, Cout),  lambda n, b: (b, 0, 0)),  # gain row
            pl.BlockSpec((None, 1, Cout),  lambda n, b: (b, 0, 0)),  # beta row
        ],
        out_specs=pl.BlockSpec((None, TN, Cout), lambda n, b: (b, n, 0)),
        compiler_params=pltpu.CompilerParams(
            dimension_semantics=("parallel", "parallel")),
        cost_estimate=cost,
    )(x, w, gain3, beta3)

    return out


# -------------------- deterministic parameter construction -----------------
def init_film_params(key, in_dim, out_dim, style_dim):
    ks = jax.random.split(key, 6)
    # self.linear with frequency_init(25): U(-sqrt(6/in)/25, +sqrt(6/in)/25)
    lim_w = np.sqrt(6.0 / in_dim) / 25.0
    w_lin = jax.random.uniform(ks[0], (in_dim, out_dim),
                               minval=-lim_w, maxval=lim_w, dtype=jnp.float32)
    # nn.Linear default bias init: U(-1/sqrt(in), 1/sqrt(in))
    lim_b = 1.0 / np.sqrt(in_dim)
    b_lin = jax.random.uniform(ks[1], (1, out_dim),
                               minval=-lim_b, maxval=lim_b, dtype=jnp.float32)

    # gain_fc / bias_fc: default-ish uniform init, then weight *= 0.25
    lim_s = 1.0 / np.sqrt(style_dim)
    w_gain = 0.25 * jax.random.uniform(ks[2], (style_dim, out_dim),
                                       minval=-lim_s, maxval=lim_s,
                                       dtype=jnp.float32)
    b_gain = jax.random.uniform(ks[3], (1, out_dim),
                                minval=-lim_s, maxval=lim_s, dtype=jnp.float32)
    w_bias = 0.25 * jax.random.uniform(ks[4], (style_dim, out_dim),
                                       minval=-lim_s, maxval=lim_s,
                                       dtype=jnp.float32)
    b_bias = jax.random.uniform(ks[5], (1, out_dim),
                                minval=-lim_s, maxval=lim_s, dtype=jnp.float32)
    return dict(w_lin=w_lin, b_lin=b_lin,
                w_gain=w_gain, b_gain=b_gain,
                w_bias=w_bias, b_bias=b_bias)


# ------------------------------ reference ----------------------------------
def film_ref(x, style, p):
    h = x @ p["w_lin"] + p["b_lin"]                       # (B, N, Cout)
    gain = style @ p["w_gain"] + p["b_gain"]              # (B, Cout)
    gain = gain * 15.0 + 30.0
    bias = style @ p["w_bias"] + p["b_bias"]              # (B, Cout)
    return jnp.sin(gain[:, None, :] * h + bias[:, None, :])


# -------------------------------- main --------------------------------------
if __name__ == "__main__":
    key = jax.random.PRNGKey(0)

    # --- test 1: tiny shape (toy config), full-f32 path, tight tolerance ----
    B, N, in_dim, out_dim, style_dim = 2, 8, 32, 32, 16
    k_x, k_s, k_p, key = jax.random.split(key, 4)
    x = jax.random.normal(k_x, (B, N, in_dim), dtype=jnp.float32)
    style = jax.random.normal(k_s, (B, style_dim), dtype=jnp.float32)
    params = init_film_params(k_p, in_dim, out_dim, style_dim)

    out = jax.block_until_ready(film_layer(x, style, params))
    ref = film_ref(x, style, params)
    np.testing.assert_allclose(np.asarray(out), np.asarray(ref),
                               rtol=1e-5, atol=1e-5)

    # --- test 2: ragged N (edge-masked tile), non-128 Cout; f32 + bf16 MXU ---
    B2, N2, in2, out2, sty2 = 2, 300, 48, 96, 20
    k_x2, k_s2, k_p2, key = jax.random.split(key, 4)
    x2 = jax.random.normal(k_x2, (B2, N2, in2), dtype=jnp.float32)
    style2 = jax.random.normal(k_s2, (B2, sty2), dtype=jnp.float32)
    params2 = init_film_params(k_p2, in2, out2, sty2)
    ref2 = film_ref(x2, style2, params2)

    out2_f32 = jax.block_until_ready(film_layer(x2, style2, params2))
    np.testing.assert_allclose(np.asarray(out2_f32), np.asarray(ref2),
                               rtol=1e-5, atol=1e-5)

    out2_bf16mxu = jax.block_until_ready(
        film_layer(x2, style2, params2, mxu_dtype=jnp.bfloat16))
    np.testing.assert_allclose(np.asarray(out2_bf16mxu), np.asarray(ref2),
                               rtol=5e-2, atol=5e-2)

    # --- test 3: lane-dense Cout=128, large tile, full bf16 path -------------
    # (bf16 MXU inputs + bf16 epilogue + bf16 output stores: the v6e/v7x VALU
    #  lever and the v5e/v6e HBM-write lever; loose tolerance by construction.)
    B3, N3, in3, out3, sty3 = 1, 1024, 32, 128, 16
    k_x3, k_s3, k_p3, key = jax.random.split(key, 4)
    x3 = jax.random.normal(k_x3, (B3, N3, in3), dtype=jnp.float32)
    style3 = jax.random.normal(k_s3, (B3, sty3), dtype=jnp.float32)
    params3 = init_film_params(k_p3, in3, out3, sty3)
    ref3 = film_ref(x3, style3, params3)

    out3_bf16 = jax.block_until_ready(
        film_layer(x3, style3, params3,
                   mxu_dtype=jnp.bfloat16,
                   epilogue_dtype=jnp.bfloat16,
                   out_dtype=jnp.bfloat16))
    np.testing.assert_allclose(np.asarray(out3_bf16.astype(jnp.float32)),
                               np.asarray(ref3), rtol=1.5e-1, atol=1.5e-1)

    print("KERNEL_OK")
</pallas_src>

<mosaic_0001>
module attributes {stable_mosaic.version = 11 : i64} {
  func.func @film_kernel(%arg0: i32, %arg1: i32, %arg2: memref<1x8x32xf32, #tpu.memory_space<vmem>>, %arg3: memref<32x32xf32, #tpu.memory_space<vmem>>, %arg4: memref<1x1x32xf32, #tpu.memory_space<vmem>>, %arg5: memref<1x1x32xf32, #tpu.memory_space<vmem>>, %arg6: memref<1x8x32xf32, #tpu.memory_space<vmem>>) attributes {dimension_semantics = [#tpu.dimension_semantics<parallel>, #tpu.dimension_semantics<parallel>], iteration_bounds = array<i64: 1, 2>, scalar_prefetch = 0 : i64, scratch_operands = 0 : i64, tpu.core_type = #tpu.core_type<tc>, window_params = [{transform_indices = @transform_0, window_bounds = array<i64: 1, 8, 32>}, {pipeline_mode = #tpu.pipeline_mode<synchronous>, transform_indices = @transform_1, window_bounds = array<i64: 32, 32>}, {transform_indices = @transform_2, window_bounds = array<i64: 1, 1, 32>}, {transform_indices = @transform_3, window_bounds = array<i64: 1, 1, 32>}, {transform_indices = @transform_4, window_bounds = array<i64: 1, 8, 32>}]} {
    %c0 = arith.constant 0 : index
    %c0_0 = arith.constant 0 : index
    %c0_1 = arith.constant 0 : index
    %0 = vector.load %arg2[%c0, %c0_0, %c0_1] : memref<1x8x32xf32, #tpu.memory_space<vmem>>, vector<1x8x32xf32>
    %1 = vector.shape_cast %0 : vector<1x8x32xf32> to vector<8x32xf32>
    %c0_2 = arith.constant 0 : index
    %c0_3 = arith.constant 0 : index
    %2 = vector.load %arg3[%c0_2, %c0_3] : memref<32x32xf32, #tpu.memory_space<vmem>>, vector<32x32xf32>
    %cst = arith.constant dense<0.000000e+00> : vector<8x32xf32>
    %3 = tpu.matmul %1, %2, %cst {dimension_numbers = #tpu.dot_dimension_numbers<[1], [0], [0], [1], [0, 0, 1, 1], [], []>} : vector<8x32xf32>, vector<32x32xf32>, vector<8x32xf32> -> vector<8x32xf32>
    %c0_4 = arith.constant 0 : index
    %c0_5 = arith.constant 0 : index
    %c0_6 = arith.constant 0 : index
    %4 = vector.load %arg4[%c0_4, %c0_5, %c0_6] : memref<1x1x32xf32, #tpu.memory_space<vmem>>, vector<1x1x32xf32>
    %5 = vector.shape_cast %4 : vector<1x1x32xf32> to vector<1x32xf32>
    %c0_7 = arith.constant 0 : index
    %c0_8 = arith.constant 0 : index
    %c0_9 = arith.constant 0 : index
    %6 = vector.load %arg5[%c0_7, %c0_8, %c0_9] : memref<1x1x32xf32, #tpu.memory_space<vmem>>, vector<1x1x32xf32>
    %7 = vector.shape_cast %6 : vector<1x1x32xf32> to vector<1x32xf32>
    %8 = vector.broadcast %5 : vector<1x32xf32> to vector<8x32xf32>
    %9 = arith.mulf %8, %3 : vector<8x32xf32>
    %10 = vector.broadcast %7 : vector<1x32xf32> to vector<8x32xf32>
    %11 = arith.addf %9, %10 : vector<8x32xf32>
    %12 = math.sin %11 : vector<8x32xf32>
    %c0_10 = arith.constant 0 : index
    %c0_11 = arith.constant 0 : index
    %c0_12 = arith.constant 0 : index
    %13 = vector.load %arg6[%c0_10, %c0_11, %c0_12] : memref<1x8x32xf32, #tpu.memory_space<vmem>>, vector<1x8x32xf32>
    %14 = vector.shape_cast %13 : vector<1x8x32xf32> to vector<8x32xf32>
    %15 = vector.shape_cast %12 : vector<8x32xf32> to vector<1x8x32xf32>
    tpu.vector_store %arg6[%c0_10, %c0_11, %c0_12], %15 {strides = array<i32>} : memref<1x8x32xf32, #tpu.memory_space<vmem>>, vector<1x8x32xf32>,
    return
  }
  func.func @transform_0(%arg0: i32, %arg1: i32) -> (i32, i32, i32) {
    %c0_i32 = arith.constant 0 : i32
    %c0_i32_0 = arith.constant 0 : i32
    return %arg1, %arg0, %c0_i32 : i32, i32, i32
  }
  func.func @transform_1(%arg0: i32, %arg1: i32) -> (i32, i32) {
    %c0_i32 = arith.constant 0 : i32
    %c0_i32_0 = arith.constant 0 : i32
    %c0_i32_1 = arith.constant 0 : i32
    return %c0_i32, %c0_i32_0 : i32, i32
  }
  func.func @transform_2(%arg0: i32, %arg1: i32) -> (i32, i32, i32) {
    %c0_i32 = arith.constant 0 : i32
    %c0_i32_0 = arith.constant 0 : i32
    %c0_i32_1 = arith.constant 0 : i32
    return %arg1, %c0_i32, %c0_i32_0 : i32, i32, i32
  }
  func.func @transform_3(%arg0: i32, %arg1: i32) -> (i32, i32, i32) {
    %c0_i32 = arith.constant 0 : i32
    %c0_i32_0 = arith.constant 0 : i32
    %c0_i32_1 = arith.constant 0 : i32
    return %arg1, %c0_i32, %c0_i32_0 : i32, i32, i32
  }
  func.func @transform_4(%arg0: i32, %arg1: i32) -> (i32, i32, i32) {
    %c0_i32 = arith.constant 0 : i32
    %c0_i32_0 = arith.constant 0 : i32
    return %arg1, %arg0, %c0_i32 : i32, i32, i32
  }
}

</mosaic_0001>

<bundles_post_ra>
// kernel: tpu_custom_call.1
= control target key start
LH: loop header
LB: loop body
LE: loop exit
PB: predicated region body
PF: predicated region fallthrough
CT: control target
= control target key end

     0   :  { %s1181_s0 = inlined_call_operand.hbm [shape: f32[2,8,32], index: 0, kind: input, shape index: {}]   ;;  %s1182_s1 = inlined_call_operand.hbm [shape: f32[32,32], index: 1, kind: input, shape index: {}]   ;;  %s1183_s2 = inlined_call_operand.hbm [shape: f32[2,1,32], index: 2, kind: input, shape index: {}]   ;;  %s1184_s3 = inlined_call_operand.vmem [shape: f32[2,1,32], index: 3, kind: input, shape index: {}]   ;;  %s1185_s4 = inlined_call_operand.hbm [shape: f32[2,8,32], index: 4, kind: output, shape index: {}]  }
   0x1   :  { %1186 = sst [smem:[#allocation13_spill]] %s1181_s0 }
   0x2   :  { %9 = vsyncpa [#allocation3], 0 }
   0x3   :  { %11 = vsyncpa [#allocation3 + $0x1], 0 }
   0x4   :  { %12 = vsyncpa [#allocation6], 0 }
   0x5   :  { %13 = vsyncpa [#allocation4], 0 }
   0x6   :  { %15 = vsyncpa [#allocation4 + $0x1], 0  ;;  %s947_s15 = smov 0   ;;  %s949_s16 = smov 0  }
   0x7   :  { %s951_s17 = smov 0   ;;  %s953_s18 = smov 0  }
   0x8   :  { %s955_s19 = smov 0   ;;  %s957_s20 = smov 0  }
   0x9 LB: > { %s978_s21 = sadd.s32 4294967295, %s910_s20   ;;  %s623_s22 = sadd.s32 4294967294, %s910_s20   ;;  %s910_s20 = sphi %s957_s20, %s21_s20   ;;  %s906_s19 = sphi %s955_s19, %s1198_s19   ;;  %s902_s18 = sphi %s953_s18, %s1197_s18   ;;  %s898_s17 = sphi %s951_s17, %s1196_s17   ;;  %s894_s16 = sphi %s949_s16, %s1195_s16   ;;  %s890_s15 = sphi %s947_s15, %s1194_s15  }
   0xa   : > { %s30_s23 = sadd.s32 1, %s906_s19  ;;  %s42_s24 = sadd.s32 1, %s898_s17 }
   0xb   : > { %p31_p0 = scmp.ge.s32.totalorder %s30_s23, 2  ;;  %p49_p1 = scmp.ne.s32.totalorder %s898_s17, %s894_s16 }
   0xc   : > { %p50_p2 = scmp.eq.s32.totalorder %s910_s20, 0  ;;  %p55_p3 = scmp.ne.s32.totalorder %s894_s16, %s890_s15 }
   0xd   : > { %s1200_s23 = smov (%p31_p0, %s30_s23), 0  ;;  %p154_p5 = scmp.eq.s32.totalorder %s978_s21, 1 }
   0xe   : > { %p990_p4 = por %p50_p2, %p49_p1  ;;  %s37_s26 = ssub.s32 %s906_s19, %s1200_s23 }
   0xf   : > { %p160_p6 = scmp.eq.s32.totalorder %s623_s22, 1  ;;  %p40_p7 = scmp.eq.s32.totalorder %s37_s26, 0 }
  0x10   : > { %p997_p8 = por %p154_p5, %p49_p1  ;;  %p626_p10 = scmp.ge.s32.totalorder %s910_s20, 2 }
  0x11   : > { %p1004_p9 = por %p160_p6, %p55_p3  ;;  %p667_p11 = scmp.lt.s32.totalorder %s910_s20, 2 }
  0x12   : > { %s1009_s29 = scalar_select %p40_p7, %s898_s17, %s42_s24  }
  0x13   : > { %s194_s30 = sand.u32 1, %s910_s20   ;;  %s196_s5 = sand.u32 1, %s898_s17  }
  0x14   : > { %s627_s6 = sshll.u32 %s196_s5, 3  ;;  %s628_s7 = sshll.u32 %s906_s19, 3 }
  0x15   : > { %s1190_s0 = sld [smem:[#allocation13_spill]]  ;;  %s198_s11 = scalar_lea.vmem [#allocation2], %s627_s6 }
  0x16   : > { %s207_s12 = sshll.u32 %s198_s11, 4  ;;  %p1021_p12 = pnand %p667_p11, %p990_p4  ;;  %s208_s12 = int_to_ptr.vmem [resolvable:$true] %s207_s12 }
  0x17   : > { %p56_p13 = scmp.eq.s32.totalorder %s978_s21, 0  ;;  %s195_s22 = scalar_lea.sflag [#allocation3], %s194_s30 }
  0x18   : > { %p624_p1 = scmp.ge.s32.totalorder %s910_s20, 1  ;;  %p167_p2 = scmp.lt.s32.totalorder %s910_s20, 3 }
  0x19   : > { %p1033_p0 = por %p56_p13, %p55_p3  ;;  %s178_s6 = sshll.u32 %s1182_s1, 4  ;;  %s179_s6 = int_to_ptr.hbm [resolvable:$true] %s178_s6 }
  0x1a   : > { %p1042_p4 = pnand %p624_p1, %p167_p2  ;;  %s912_s30 = smov [#allocation5]  }
  0x1b   : > { %s203_s10 = scalar_lea.hbm %s1190_s0, %s628_s7  ;;  %s180_s8 = sshll.u32 %s912_s30, 4  ;;  %s181_s8 = int_to_ptr.vmem [resolvable:$true] %s180_s8 }
  0x1c   : > { %s205_s13 = sshll.u32 %s203_s10, 4  ;;  %p651_p3 = pneg %p1042_p4  ;;  %s206_s13 = int_to_ptr.hbm [resolvable:$true] %s205_s13 }
  0x1d   : > { %658 = dma.hbm_to_vmem [thread:$0]  (!%p1021_p12), %s206_s13, 128, %s208_s12, %s195_s22  }
  0x1e   : > { %s220_s11 = scalar_lea.hbm %s1183_s2, %s906_s19  ;;  %p652_p5 = pnand %p651_p3, %p56_p13 }
  0x1f   : > { %s222_s12 = sshll.u32 %s220_s11, 4  ;;  %s217_s13 = scalar_lea.vmem [#allocation7], %s196_s5  ;;  %s223_s12 = int_to_ptr.hbm [resolvable:$true] %s222_s12 }
  0x20   : > { %s224_s26 = sshll.u32 %s217_s13, 4  ;;  %s913_s25 = smov 128   ;;  %s225_s26 = int_to_ptr.vmem [resolvable:$true] %s224_s26 }
  0x21   : > { %s914_s0 = smov 8   ;;  %239 = sbr.rel (%p1042_p4) target bundleno = 281 (0x119), region = 36 }
  0x22   : > { %654 = dma.hbm_to_vmem [thread:$0]  (!%p652_p5), %s179_s6, 512, %s181_s8, [#allocation6], %s913_s25, %s913_s25, %s914_s0  }
  0x23   : > { %661 = dma.hbm_to_vmem [thread:$0]  (!%p1021_p12), %s223_s12, 16, %s225_s26, %s195_s22  }
  0x24   : > { %s241_s30 = sand.u32 (!%p1042_p4), 1, %s978_s21   ;;  %s1060_s9 = sand.u32 (!%p1042_p4), 1, %s894_s16  }
  0x25   : > { %s630_s10 = sshll.u32 (!%p1042_p4), %s1060_s9, 3  ;;  %s242_s5 = scalar_lea.sflag (!%p1042_p4), [#allocation3], %s241_s30 }
  0x26   : > { %s245_s11 = scalar_lea.vmem [#allocation2], %s630_s10 }
  0x27   : > { %873 = dma.done.wait (%p1033_p0), %s242_s5, 128  }
  0x28   : > { %875 = vsyncadd (%p1033_p0), %s242_s5, 4294967168 }
  0x29   : > { %877 = dma.done.wait (%p56_p13), [#allocation6], 512  }
  0x2a   : > { %879 = vsyncadd (%p56_p13), [#allocation6], 4294966784  ;;  %s259_s0 = scalar_lea.vmem [#allocation7], %s1060_s9 }
  0x2b   : > { %881 = dma.done.wait (%p1033_p0), %s242_s5, 16  }
  0x2c   : > { %883 = vsyncadd (%p1033_p0), %s242_s5, 4294967280  ;;  %p292_p6 = scmp.lt.s32.totalorder %s902_s18, 1  ;;  %v299_v0 = vld [vmem:[#allocation5 + $0x18] sm:$0xff]  ;;  %v298_v1 = vld [vmem:[#allocation5 + $0x10] sm:$0xff]  ;;  %vm300_vm0 = vcmask 261120   ;;  %s638_s24 = sshll.u32 %s902_s18, 3 }
  0x2d   : > { %316 = vmatpush.msra.mxu0 %v299_v0  ;;  %v297_v2 = vld [vmem:[#allocation5 + $0x8] sm:$0xff]  ;;  %v296_v3 = vld [vmem:[#allocation5] sm:$0xff]  ;;  %v295_v4 = vld [vmem:[%s245_s11] sm:$0xff]  ;;  %v915_v21 = vmov 683565275   ;;  %s502_s12 = scalar_lea.hbm %s1185_s4, %s638_s24  ;;  %s291_s13 = scalar_lea.vmem [#allocation8], %s630_s10 }
  0x2e   : > { %s293_s14 = scalar_select %p292_p6, %s902_s18, 1  ;;  %v728_v5 = vld [vmem:[%s259_s0] ss:$0 sm:$0xff]  ;;  %v916_v23 = vmov 2475754826  }
  0x2f   : > { %317 = vmatpush.msra.mxu0 %v298_v1  ;;  %v917_v26 = vmov 2131351028   ;;  %v918_v29 = vmov 2102212464   ;;  %v919_v32 = vmov 920167782  }
  0x30   : > { %s294_s21 = scalar_lea.vmem %s1184_s3, %s293_s14  ;;  %v920_v35 = vmov 1326507024   ;;  %s504_s26 = sshll.u32 %s291_s13, 4  ;;  %s505_s26 = int_to_ptr.vmem [resolvable:$true] %s504_s26 }
  0x31   : > { %318 = vmatpush.msra.mxu0 %v297_v2  ;;  %v729_v6 = vld [vmem:[%s294_s21] ss:$0 sm:$0xff]  ;;  %s506_s25 = sshll.u32 %s502_s12, 4  ;;  %s491_s18 = scalar_lea.sflag [#allocation4], %s1060_s9  ;;  %s507_s25 = int_to_ptr.hbm [resolvable:$true] %s506_s25 }
  0x32   : > { %s834_s30 = sshra.s32 %s507_s25, 4  ;;  %s840_s0 = scalar_lea.hbm %s1185_s4, 16  ;;  %s835_s30 = int_to_ptr.hbm [resolvable:$true] %s834_s30 }
  0x33   : > { %319 = vmatpush.msra.mxu0 %v296_v3  ;;  %s836_s10 = scalar_lea.hbm %s835_s30, 8  ;;  %p841_p13 = scmp.lt.s32.totalorder %s835_s30, %s1185_s4 }
  0x34   : > { %633 = vmatmul.msk.f32.vlgmr.msra.gmra.mxu0 %vm300_vm0, %v295_v4  ;;  %p837_p7 = scmp.ne.s32.totalorder %s835_s30, %s836_s10  ;;  %p842_p0 = scmp.lt.s32.totalorder %s840_s0, %s836_s10 }
  0x36   : > { %p838_p11 = pnand %p837_p7, %p997_p8  ;;  %p843_p1 = por %p842_p0, %p841_p13 }
  0x38   : > { %p839_p12 = pneg %p838_p11 }
  0x3a   : > { %p844_p2 = pnand %p843_p1, %p839_p12 }
  0xb1   : > { %v321_v7 = vpop.f32.mrf.mxu0 }
  0xb2   : > { %v329_v8 = vmul.f32 %v728_v5, %v321_v7  ;;  %v921_v5 = vmov 0  }
  0xb4   : > { %v1084_v9 = vadd.f32 %v729_v6, %v329_v8 }
  0xb6   : > { %v337_v10 = vand.u32 2139095040, %v1084_v9  ;;  %v334_v13 = vand.u32 2147483647, %v1084_v9  ;;  %vm336_vm13 = vcmp.lt.s32.totalorder %v1084_v9, 0 }
  0xb8   : > { %v338_v11 = vshrl.u32 %v337_v10, 23  ;;  %v341_v15 = vand.u32 8388607, %v334_v13  ;;  %vm335_vm14 = vcmp.le.f32.partialorder %v334_v13, 0.7853982 }
  0xba   : > { %v634_v12 = vadd.s32 4294967169, %v338_v11  ;;  %v342_v19 = vor.u32 8388608, %v341_v15 }
  0xbc   : > { %v344_v14 = vadd.s32 1, %v634_v12  ;;  %v1101_v42 = vshll.u32 %v342_v19, 8 }
  0xbe   : > { %vm345_vm1 = vcmp.gt.s32.totalorder %v344_v14, 0  ;;  %v383_v51 = vand.u32 65535, %v1101_v42  ;;  %v384_v52 = vshrl.u32 %v1101_v42, 16 }
  0xbf   : > { %v346_v16 = vsel %vm345_vm1, %v344_v14, 0 }
  0xc0   : > { %v348_v17 = vand.u32 31, %v346_v16  ;;  %v1092_v20 = vshrl.u32 %v346_v16, 5 }
  0xc2   : > { %v1090_v18 = vsub.s32 32, %v348_v17  ;;  %v351_v22 = vshll.u32 %v915_v21, %v348_v17  ;;  %v354_v24 = vshll.u32 %v916_v23, %v348_v17  ;;  %v357_v28 = vshll.u32 %v917_v26, %v348_v17 }
  0xc3   : > { %v360_v31 = vshll.u32 %v918_v29, %v348_v17  ;;  %v363_v34 = vshll.u32 %v919_v32, %v348_v17  ;;  %vm366_vm2 = vcmp.lt.s32.totalorder %v1092_v20, 1  ;;  %vm369_vm3 = vcmp.lt.s32.totalorder %v1092_v20, 4 }
  0xc4   : > { %v352_v25 = vshrl.u32 %v916_v23, %v1090_v18  ;;  %v355_v27 = vshrl.u32 %v917_v26, %v1090_v18  ;;  %v358_v30 = vshrl.u32 %v918_v29, %v1090_v18  ;;  %v361_v33 = vshrl.u32 %v919_v32, %v1090_v18 }
  0xc5   : > { %v364_v36 = vshrl.u32 %v920_v35, %v1090_v18  ;;  %vm368_vm4 = vcmp.lt.s32.totalorder %v1092_v20, 3  ;;  %vm367_vm5 = vcmp.lt.s32.totalorder %v1092_v20, 2  ;;  %v350_v16 = vshrl.u32 %v915_v21, %v1090_v18 }
  0xc6   : > { %v353_v37 = vor.u32 %v352_v25, %v351_v22  ;;  %v356_v38 = vor.u32 %v355_v27, %v354_v24  ;;  %v359_v39 = vor.u32 %v358_v30, %v357_v28  ;;  %v362_v40 = vor.u32 %v361_v33, %v360_v31 }
  0xc7   : > { %v365_v41 = vor.u32 %v364_v36, %v363_v34 }
  0xc8   : > { %v374_v43 = vsel %vm366_vm2, %v353_v37, %v356_v38  ;;  %v378_v44 = vsel %vm366_vm2, %v356_v38, %v359_v39  ;;  %v375_v45 = vsel %vm369_vm3, %v362_v40, 920167782  ;;  %v371_v12 = vsel %vm369_vm3, %v359_v39, 2102212464 }
  0xc9   : > { %v379_v46 = vsel %vm369_vm3, %v365_v41, 1326507024  ;;  %v376_v47 = vsel %vm368_vm4, %v359_v39, %v375_v45  ;;  %v370_v25 = vsel %vm366_vm2, %v350_v16, %v353_v37  ;;  %v372_v26 = vsel %vm368_vm4, %v356_v38, %v371_v12 }
  0xca   : > { %v380_v48 = vsel %vm368_vm4, %v362_v40, %v379_v46  ;;  %v377_v49 = vsel %vm367_vm5, %v374_v43, %v376_v47  ;;  %v373_v18 = vsel %vm367_vm5, %v370_v25, %v372_v26  ;;  %vm477_vm3 = vweird.f32 %v1084_v9 }
  0xcb   : > { %v381_v50 = vsel %vm367_vm5, %v378_v44, %v380_v48  ;;  %v407_v55 = vand.u32 65535, %v377_v49  ;;  %v408_v56 = vshrl.u32 %v377_v49, 16  ;;  %v427_v34 = vmul.u32 %v1101_v42, %v373_v18 }
  0xcc   : > { %v385_v53 = vand.u32 65535, %v381_v50  ;;  %v386_v54 = vshrl.u32 %v381_v50, 16 }
  0xcd   : > { %v410_v59 = vmul.u32 %v408_v56, %v383_v51  ;;  %v411_v60 = vmul.u32 %v407_v55, %v384_v52  ;;  %v409_v0 = vmul.u32 %v407_v55, %v383_v51  ;;  %v412_v4 = vmul.u32 %v408_v56, %v384_v52 }
  0xce   : > { %v388_v57 = vmul.u32 %v386_v54, %v383_v51  ;;  %v389_v58 = vmul.u32 %v385_v53, %v384_v52  ;;  %v387_v61 = vmul.u32 %v385_v53, %v383_v51  ;;  %v390_v63 = vmul.u32 %v386_v54, %v384_v52 }
  0xcf   : > { %v413_v1 = vshll.u32 %v410_v59, 16  ;;  %v415_v7 = vshll.u32 %v411_v60, 16  ;;  %v414_v23 = vshrl.u32 %v410_v59, 16  ;;  %v416_v29 = vshrl.u32 %v411_v60, 16 }
  0xd0   : > { %v391_v62 = vshll.u32 %v388_v57, 16  ;;  %v393_v2 = vshll.u32 %v389_v58, 16  ;;  %v392_v17 = vshrl.u32 %v388_v57, 16  ;;  %v394_v27 = vshrl.u32 %v389_v58, 16 }
  0xd1   : > { %vm417_vm7 = vc.u32 %v409_v0, %v413_v1  ;;  %v419_v8 = vadd.s32 %v413_v1, %v409_v0 }
  0xd2   : > { %vm395_vm6 = vc.u32 %v387_v61, %v391_v62  ;;  %v397_v3 = vadd.s32 %v391_v62, %v387_v61  ;;  %v418_v11 = vsel %vm417_vm7, 1, %v921_v5 }
  0xd3   : > { %v396_v6 = vsel %vm395_vm6, 1, %v921_v5  ;;  %v420_v15 = vadd.s32 %v418_v11, %v412_v4  ;;  %vm421_vm9 = vc.u32 %v419_v8, %v415_v7  ;;  %v423_v32 = vadd.s32 %v419_v8, %v415_v7 }
  0xd4   : > { %v398_v10 = vadd.s32 %v396_v6, %v390_v63  ;;  %vm399_vm8 = vc.u32 %v397_v3, %v393_v2  ;;  %v422_v22 = vsel %vm421_vm9, 1, %v921_v5 }
  0xd5   : > { %v400_v14 = vsel %vm399_vm8, 1, %v921_v5  ;;  %v424_v24 = vadd.s32 %v422_v22, %v420_v15 }
  0xd6   : > { %v402_v19 = vadd.s32 %v400_v14, %v398_v10 }
  0xd7   : > { %v425_v30 = vadd.s32 %v424_v24, %v414_v23 }
  0xd8   : > { %v403_v28 = vadd.s32 %v402_v19, %v392_v17 }
  0xd9   : > { %v426_v21 = vadd.s32 %v425_v30, %v416_v29 }
  0xda   : > { %v404_v31 = vadd.s32 %v403_v28, %v394_v27 }
  0xdb   : > { %v430_v33 = vadd.s32 1, %v426_v21 }
  0xdc   : > { %vm429_vm10 = vc.u32 %v404_v31, %v423_v32  ;;  %v428_v20 = vadd.s32 %v423_v32, %v404_v31 }
  0xdd   : > { %v431_v35 = vsel %vm429_vm10, %v430_v33, %v426_v21 }
  0xde   : > { %v432_v36 = vadd.s32 %v431_v35, %v427_v34 }
  0xe0   : > { %v433_v37 = vadd.s32 536870912, %v432_v36 }
  0xe2   : > { %v434_v39 = vshrl.u32 %v433_v37, 30 }
  0xe4   : > { %v435_v40 = vshll.u32 %v434_v39, 30  ;;  %v458_v59 = vsub.s32 4, %v434_v39 }
  0xe6   : > { %v436_v38 = vsub.s32 %v432_v36, %v435_v40  ;;  %v459_v0 = vsel %vm336_vm13, %v458_v59, %v434_v39 }
  0xe7   : > { %v461_v3 = vsel %vm335_vm14, 0, %v459_v0 }
  0xe8   : > { %vm437_vm11 = vcmp.lt.s32.totalorder %v436_v38, 0  ;;  %v438_v41 = vsub.s32 0, %v436_v38  ;;  %v478_v8 = vadd.s32 3, %v461_v3 }
  0xea   : > { %v439_v43 = vsel %vm437_vm11, %v438_v41, %v436_v38  ;;  %v479_v14 = vand.u32 3, %v478_v8 }
  0xeb   : > { %v440_v44 = vclz %v439_v43 }
  0xec   : > { %vm481_vm15 = vcmp.eq.s32.totalorder %v479_v14, 0  ;;  %vm484_vm1 = vcmp.eq.s32.totalorder %v479_v14, 2  ;;  %vm480_vm2 = vcmp.lt.s32.totalorder %v479_v14, 2 }
  0xed   : > { %v635_v45 = vadd.s32 4294967294, %v440_v44 }
  0xef   : > { %vm636_vm12 = vcmp.lt.s32.totalorder %v635_v45, 0 }
  0xf0   : > { %v443_v46 = vsel %vm636_vm12, 0, %v635_v45 }
  0xf1   : > { %v444_v47 = vsub.s32 32, %v443_v46  ;;  %v448_v48 = vsub.s32 4294967266, %v443_v46  ;;  %v445_v49 = vshll.u32 %v436_v38, %v443_v46 }
  0xf3   : > { %v446_v50 = vshrl.u32 %v428_v20, %v444_v47  ;;  %v449_v51 = vadd.s32 127, %v448_v48 }
  0xf5   : > { %v447_v42 = vor.u32 %v446_v50, %v445_v49  ;;  %v450_v52 = vshll.u32 %v449_v51, 23 }
  0xf7   : > { %v451_v53 = vor.u32 4788187, %v450_v52  ;;  %v454_v55 = vcvt.s32.f32 %v447_v42 }
  0xf9   : > { %v452_v54 = vand.u32 2147483647, %v451_v53 }
  0xfb   : > { %v455_v56 = vmul.f32 %v454_v55, %v452_v54 }
  0xfd   : > { %v456_v57 = vxor.u32 2147483648, %v455_v56 }
  0xff   : > { %v457_v58 = vsel %vm336_vm13, %v456_v57, %v455_v56 }
 0x100   : > { %v460_v60 = vsel %vm335_vm14, %v1084_v9, %v457_v58 }
 0x101   : > { %v462_v61 = vmul.f32 %v460_v60, %v460_v60 }
 0x103   : > { %v470_v62 = vmul.f32 -0.00019511016, %v462_v61  ;;  %v463_v63 = vmul.f32 -0.001358992, %v462_v61 }
 0x105   : > { %v471_v1 = vadd.f32 0.008332121, %v470_v62  ;;  %v464_v2 = vadd.f32 0.041655596, %v463_v63 }
 0x107   : > { %v472_v4 = vmul.f32 %v471_v1, %v462_v61  ;;  %v465_v5 = vmul.f32 %v464_v2, %v462_v61 }
 0x109   : > { %v473_v6 = vadd.f32 -0.16666654, %v472_v4  ;;  %v466_v7 = vadd.f32 -0.4999988, %v465_v5 }
 0x10b   : > { %v474_v10 = vmul.f32 %v473_v6, %v462_v61  ;;  %v467_v13 = vmul.f32 %v466_v7, %v462_v61 }
 0x10d   : > { %v475_v11 = vadd.f32 1.0, %v474_v10  ;;  %v468_v12 = vadd.f32 1.0, %v467_v13 }
 0x10f   : > { %v476_v15 = vmul.f32 %v475_v11, %v460_v60  ;;  %v485_v16 = vxor.u32 2147483648, %v468_v12 }
 0x111   : > { %v482_v17 = vxor.u32 2147483648, %v476_v15  ;;  %v486_v22 = vsel %vm484_vm1, %v485_v16, %v476_v15 }
 0x113   : > { %v483_v19 = vsel %vm481_vm15, %v468_v12, %v482_v17 }
 0x114   : > { %v487_v23 = vsel %vm480_vm2, %v483_v19, %v486_v22 }
 0x115   : > { %v488_v24 = vsel %vm477_vm3, nan, %v487_v23 }
 0x116   : > { %489 = vst.msk [vmem:[%s291_s13] sm:$0xff] %vm300_vm0, %v488_v24 }
 0x117   : > { %847 = shalt.err (!%p844_p2)
}
 0x118   : > { %649 = dma.vmem_to_hbm [thread:$0]  (%p997_p8), %s505_s26, 128, %s507_s25, %s491_s18  }
 0x119 PF: > { %s518_s9 = sand.u32 1, %s890_s15   ;;  %p663_p4 = pnand %p626_p10, %p1004_p9 }
 0x11a   : > { %s519_s6 = scalar_lea.sflag [#allocation4], %s518_s9 }
 0x11b   : > { %p664_p3 = pneg %p663_p4 }
 0x11d   : > { %885 = dma.done.wait (%p664_p3), %s519_s6, 128  }
 0x11e   : > { %887 = vsyncadd (%p664_p3), %s519_s6, 4294967168  ;;  %s21_s20 = sadd.s32 1, %s910_s20   ;;  %s1194_s15 = smov %s894_s16 }
 0x11f   : > { %p18_p5 = scmp.ge.s32.totalorder %s21_s20, 4   ;;  %s1195_s16 = smov %s898_s17 }
 0x120   : > { %s1196_s17 = smov %s1009_s29  ;;  %s1197_s18 = smov %s906_s19 }
 0x121   : > { %s1198_s19 = smov %s1200_s23  ;;  %20 = sbr.rel (!%p18_p5) target bundleno = 9 (0x9), region = 99 }
 0x126   :  { %525 = vsyncpa [#allocation3], 1 }
 0x127   :  { %527 = vsyncpa [#allocation3 + $0x1], 1 }
 0x128   :  { %528 = vsyncpa [#allocation6], 1 }
 0x129   :  { %529 = vsyncpa [#allocation4], 1 }
 0x12a   :  { %531 = vsyncpa [#allocation4 + $0x1], 1 }

</bundles_post_ra>
